<compile_context>
chip_gen: v7x
topology: tpu7x:2x2x1
jax: 0.10.0
libtpu: 0.0.40
codegen_flags: <defaults>
</compile_context>

<pallas_src>
import jax
import jax.numpy as jnp
import numpy as np
from jax.experimental import pallas as pl
from jax.experimental.pallas import tpu as pltpu


_VMEM = pl.BlockSpec(memory_space=pltpu.MemorySpace.VMEM)


# ----------------------------------------------------------------------------
# Fused Pallas kernel
# ----------------------------------------------------------------------------
def _encoder_fused_kernel(adj_ref, x_ref, inv_deg_ref, mask0_ref, mask1_ref,
                          w0_ref, b0_ref, w1_ref, b1_ref, wd_ref, bd_ref,
                          h_ref, cos_ref):
    """dropout -> SAGEConv('gcn') x2 (ReLU+dropout between) -> decoder cosine."""
    f32 = jnp.float32
    bf16 = jnp.bfloat16

    adj = adj_ref[...]                        # (N, N) bf16, [dst, src], 0/1 exact
    inv_deg = inv_deg_ref[...]                # (N, 1)  f32, 1 / (in_degree + 1)

    # ---- layer 0: input dropout -> mean-agg ('gcn') -> linear -> ReLU -------
    h = x_ref[...] * mask0_ref[...]           # inverted-dropout mask (pre-scaled)
    neigh = jnp.dot(adj, h.astype(bf16), preferred_element_type=f32)
    h_gcn = (neigh + h) * inv_deg
    h = jnp.dot(h_gcn.astype(bf16), w0_ref[...], preferred_element_type=f32)
    h = jnp.maximum(h + b0_ref[...], 0.0)

    # ---- inter-layer dropout -> layer 1 (no activation on last layer) -------
    h = h * mask1_ref[...]
    neigh = jnp.dot(adj, h.astype(bf16), preferred_element_type=f32)
    h_gcn = (neigh + h) * inv_deg
    h = jnp.dot(h_gcn.astype(bf16), w1_ref[...], preferred_element_type=f32)
    h = h + b1_ref[...]
    h_ref[...] = h.astype(h_ref.dtype)

    # ---- decoder: shared linear (once per node) + all-pairs cosine -----------
    ha = jnp.dot(h.astype(bf16), wd_ref[...], preferred_element_type=f32)
    ha = ha + bd_ref[...]
    eps = jnp.float32(1e-8)                   # torch CosineSimilarity eps
    ss = jnp.sum(ha * ha, axis=-1, keepdims=True)
    # row / max(||row||, eps) == row * rsqrt(max(||row||^2, eps^2))   (EUP rsqrt)
    ha_n = ha * jax.lax.rsqrt(jnp.maximum(ss, eps * eps))
    # f32 normalised gram matrix: cos_ref[i, j] == cos(linear(h_i), linear(h_j)).
    cos_ref[...] = jax.lax.dot_general(
        ha_n, ha_n, (((1,), (1,)), ((), ())), preferred_element_type=f32)


# ----------------------------------------------------------------------------
# Wrappers
# ----------------------------------------------------------------------------
def make_dropout_masks(key, n, in_dim, hid1, *, p=0.5, mode="train"):
    """Inverted-dropout masks (pre-scaled by 1/keep); all-ones in eval mode."""
    if mode != "train":
        return jnp.ones((n, in_dim), jnp.float32), jnp.ones((n, hid1), jnp.float32)
    keep = 1.0 - p
    k0, k1 = jax.random.split(key)
    mask0 = jax.random.bernoulli(k0, keep, (n, in_dim)).astype(jnp.float32) / keep
    mask1 = jax.random.bernoulli(k1, keep, (n, hid1)).astype(jnp.float32) / keep
    return mask0, mask1


def encoder_forward(adj, x, shuffled_index, sample_batch, params, mask0, mask1,
                    *, mode="train"):
    """Forward pass of Encoder.  Returns (h, dec) in train mode, else h."""
    w0, b0, w1, b1, wd, bd = params
    n, _ = x.shape
    out_dim = w1.shape[1]

    # --- one-time precompute / layout prep (cheap plain-JAX glue) ------------
    adj_f32 = adj.astype(jnp.float32)
    inv_deg = 1.0 / (jnp.sum(adj_f32, axis=1, keepdims=True) + 1.0)   # (N, 1)
    adj_bf = adj_f32.astype(jnp.bfloat16)

    h, cos = pl.pallas_call(
        _encoder_fused_kernel,
        out_shape=(jax.ShapeDtypeStruct((n, out_dim), jnp.float32),
                   jax.ShapeDtypeStruct((n, n), jnp.float32)),
        in_specs=[_VMEM] * 11,
        out_specs=(_VMEM, _VMEM),
    )(adj_bf, x, inv_deg, mask0, mask1,
      w0.astype(jnp.bfloat16), b0,
      w1.astype(jnp.bfloat16), b1,
      wd.astype(jnp.bfloat16), bd)

    if mode != "train":
        return h

    # Data-dependent (B, K) gather of the precomputed cosine matrix; equivalent
    # to cos(linear(h[sample_batch]) broadcast over K, linear(h[shuffled_index])).
    dec = cos[sample_batch[:, None], shuffled_index]
    return h, dec


def encoder_forward_ref(adj, x, shuffled_index, sample_batch, params,
                        mask0, mask1):
    """Pure-JAX f32 reference of the same forward (for correctness checking)."""
    w0, b0, w1, b1, wd, bd = params
    adj = adj.astype(jnp.float32)
    inv_deg = 1.0 / (jnp.sum(adj, axis=1, keepdims=True) + 1.0)
    h = x * mask0
    h = (adj @ h + h) * inv_deg
    h = jnp.maximum(h @ w0 + b0, 0.0)
    h = h * mask1
    h = (adj @ h + h) * inv_deg
    h = h @ w1 + b1
    ha = h @ wd + bd
    a = ha[sample_batch][:, None, :]               # (B, 1, D)
    b = ha[shuffled_index]                          # (B, K, D)
    eps = 1e-8
    num = jnp.sum(a * b, axis=-1)
    den = (jnp.maximum(jnp.linalg.norm(a, axis=-1), eps)
           * jnp.maximum(jnp.linalg.norm(b, axis=-1), eps))
    return h, num / den


# ----------------------------------------------------------------------------
# Main
# ----------------------------------------------------------------------------
if __name__ == "__main__":
    # small, forward-consistent shapes
    N = 16           # number of graph nodes
    IN_SIZE = 8
    HID1 = 16
    HID2 = 24        # NOTE: hid_size2 is unused by the original module's layers
    OUT_SIZE = 32
    DEC_SIZE = 16
    B, K = 4, 3      # sample_batch length, shuffled_index.shape[1]

    key = jax.random.PRNGKey(0)
    keys = jax.random.split(key, 8)

    # dense adjacency [dst, src]; ~25% edge density
    adj = (jax.random.uniform(keys[0], (N, N)) < 0.25).astype(jnp.float32)
    x = jax.random.normal(keys[1], (N, IN_SIZE), dtype=jnp.float32)

    sample_batch = jnp.arange(B, dtype=jnp.int32)
    shuffled_index = jax.random.randint(keys[2], (B, K), 0, N, dtype=jnp.int32)

    # deterministic parameter init (Linear-style: W stored as (in, out), bias (1, out))
    def lin(k, din, dout):
        kw, kb = jax.random.split(k)
        s = 1.0 / jnp.sqrt(jnp.float32(din))
        w = jax.random.uniform(kw, (din, dout), jnp.float32, -s, s)
        b = jax.random.uniform(kb, (1, dout), jnp.float32, -s, s)
        return w, b

    w0, b0 = lin(keys[3], IN_SIZE, HID1)      # SAGEConv 0 (fc_neigh)
    w1, b1 = lin(keys[4], HID1, OUT_SIZE)     # SAGEConv 1 (fc_neigh)
    wd, bd = lin(keys[5], OUT_SIZE, DEC_SIZE) # Decoder.linear
    params = (w0, b0, w1, b1, wd, bd)

    mask0, mask1 = make_dropout_masks(keys[6], N, IN_SIZE, HID1, mode="train")

    h_out, dec_out = encoder_forward(adj, x, shuffled_index, sample_batch,
                                     params, mask0, mask1, mode="train")
    jax.block_until_ready((h_out, dec_out))

    # shape / sanity checks
    assert h_out.shape == (N, OUT_SIZE)
    assert dec_out.shape == (B, K)
    assert bool(jnp.all(jnp.isfinite(h_out))) and bool(jnp.all(jnp.isfinite(dec_out)))
    assert bool(jnp.all(jnp.abs(dec_out) <= 1.0 + 1e-5))   # cosine similarity range

    # numerical check vs pure-JAX f32 reference (same dropout masks);
    # loose tolerance covers bf16 MXU operands with f32 accumulation.
    h_ref, dec_ref = encoder_forward_ref(adj, x, shuffled_index, sample_batch,
                                         params, mask0, mask1)
    np.testing.assert_allclose(np.asarray(h_out), np.asarray(h_ref),
                               rtol=1e-1, atol=1e-1)
    np.testing.assert_allclose(np.asarray(dec_out), np.asarray(dec_ref),
                               rtol=1e-1, atol=1e-1)

    # eval mode path (no dropout, h only)
    m0e, m1e = make_dropout_masks(keys[7], N, IN_SIZE, HID1, mode="eval")
    h_eval = encoder_forward(adj, x, shuffled_index, sample_batch,
                             params, m0e, m1e, mode="eval")
    jax.block_until_ready(h_eval)
    assert h_eval.shape == (N, OUT_SIZE)

    print("KERNEL_OK")
</pallas_src>

<mosaic_0001>
module attributes {stable_mosaic.version = 11 : i64} {
  func.func @_encoder_fused_kernel(%arg0: memref<16x16xbf16, #tpu.memory_space<vmem>>, %arg1: memref<16x8xf32, #tpu.memory_space<vmem>>, %arg2: memref<16x1xf32, #tpu.memory_space<vmem>>, %arg3: memref<16x8xf32, #tpu.memory_space<vmem>>, %arg4: memref<16x16xf32, #tpu.memory_space<vmem>>, %arg5: memref<8x16xbf16, #tpu.memory_space<vmem>>, %arg6: memref<1x16xf32, #tpu.memory_space<vmem>>, %arg7: memref<16x32xbf16, #tpu.memory_space<vmem>>, %arg8: memref<1x32xf32, #tpu.memory_space<vmem>>, %arg9: memref<32x16xbf16, #tpu.memory_space<vmem>>, %arg10: memref<1x16xf32, #tpu.memory_space<vmem>>, %arg11: memref<16x32xf32, #tpu.memory_space<vmem>>, %arg12: memref<16x16xf32, #tpu.memory_space<vmem>>) attributes {dimension_semantics = [], scalar_prefetch = 0 : i64, scratch_operands = 0 : i64, tpu.core_type = #tpu.core_type<tc>} {
    %c0 = arith.constant 0 : index
    %c0_0 = arith.constant 0 : index
    %0 = vector.load %arg0[%c0, %c0_0] : memref<16x16xbf16, #tpu.memory_space<vmem>>, vector<16x16xbf16>
    %c0_1 = arith.constant 0 : index
    %c0_2 = arith.constant 0 : index
    %1 = vector.load %arg2[%c0_1, %c0_2] : memref<16x1xf32, #tpu.memory_space<vmem>>, vector<16x1xf32>
    %c0_3 = arith.constant 0 : index
    %c0_4 = arith.constant 0 : index
    %2 = vector.load %arg1[%c0_3, %c0_4] : memref<16x8xf32, #tpu.memory_space<vmem>>, vector<16x8xf32>
    %c0_5 = arith.constant 0 : index
    %c0_6 = arith.constant 0 : index
    %3 = vector.load %arg3[%c0_5, %c0_6] : memref<16x8xf32, #tpu.memory_space<vmem>>, vector<16x8xf32>
    %4 = arith.mulf %2, %3 : vector<16x8xf32>
    %5 = arith.truncf %4 : vector<16x8xf32> to vector<16x8xbf16>
    %cst = arith.constant dense<0.000000e+00> : vector<16x8xf32>
    %6 = tpu.matmul %0, %5, %cst {dimension_numbers = #tpu.dot_dimension_numbers<[1], [0], [0], [1], [0, 0, 1, 1], [], []>} : vector<16x16xbf16>, vector<16x8xbf16>, vector<16x8xf32> -> vector<16x8xf32>
    %7 = arith.addf %6, %4 : vector<16x8xf32>
    %8 = vector.broadcast %1 : vector<16x1xf32> to vector<16x8xf32>
    %9 = arith.mulf %7, %8 : vector<16x8xf32>
    %10 = arith.truncf %9 : vector<16x8xf32> to vector<16x8xbf16>
    %c0_7 = arith.constant 0 : index
    %c0_8 = arith.constant 0 : index
    %11 = vector.load %arg5[%c0_7, %c0_8] : memref<8x16xbf16, #tpu.memory_space<vmem>>, vector<8x16xbf16>
    %cst_9 = arith.constant dense<0.000000e+00> : vector<16x16xf32>
    %12 = tpu.matmul %10, %11, %cst_9 {dimension_numbers = #tpu.dot_dimension_numbers<[1], [0], [0], [1], [0, 0, 1, 1], [], []>} : vector<16x8xbf16>, vector<8x16xbf16>, vector<16x16xf32> -> vector<16x16xf32>
    %c0_10 = arith.constant 0 : index
    %c0_11 = arith.constant 0 : index
    %13 = vector.load %arg6[%c0_10, %c0_11] : memref<1x16xf32, #tpu.memory_space<vmem>>, vector<1x16xf32>
    %14 = vector.broadcast %13 : vector<1x16xf32> to vector<16x16xf32>
    %15 = arith.addf %12, %14 : vector<16x16xf32>
    %cst_12 = arith.constant 0.000000e+00 : f32
    %16 = vector.broadcast %cst_12 : f32 to vector<16x16xf32>
    %17 = arith.maximumf %15, %16 : vector<16x16xf32>
    %c0_13 = arith.constant 0 : index
    %c0_14 = arith.constant 0 : index
    %18 = vector.load %arg4[%c0_13, %c0_14] : memref<16x16xf32, #tpu.memory_space<vmem>>, vector<16x16xf32>
    %19 = arith.mulf %17, %18 : vector<16x16xf32>
    %20 = arith.truncf %19 : vector<16x16xf32> to vector<16x16xbf16>
    %cst_15 = arith.constant dense<0.000000e+00> : vector<16x16xf32>
    %21 = tpu.matmul %0, %20, %cst_15 {dimension_numbers = #tpu.dot_dimension_numbers<[1], [0], [0], [1], [0, 0, 1, 1], [], []>} : vector<16x16xbf16>, vector<16x16xbf16>, vector<16x16xf32> -> vector<16x16xf32>
    %22 = arith.addf %21, %19 : vector<16x16xf32>
    %23 = vector.broadcast %1 : vector<16x1xf32> to vector<16x16xf32>
    %24 = arith.mulf %22, %23 : vector<16x16xf32>
    %25 = arith.truncf %24 : vector<16x16xf32> to vector<16x16xbf16>
    %c0_16 = arith.constant 0 : index
    %c0_17 = arith.constant 0 : index
    %26 = vector.load %arg7[%c0_16, %c0_17] : memref<16x32xbf16, #tpu.memory_space<vmem>>, vector<16x32xbf16>
    %cst_18 = arith.constant dense<0.000000e+00> : vector<16x32xf32>
    %27 = tpu.matmul %25, %26, %cst_18 {dimension_numbers = #tpu.dot_dimension_numbers<[1], [0], [0], [1], [0, 0, 1, 1], [], []>} : vector<16x16xbf16>, vector<16x32xbf16>, vector<16x32xf32> -> vector<16x32xf32>
    %c0_19 = arith.constant 0 : index
    %c0_20 = arith.constant 0 : index
    %28 = vector.load %arg8[%c0_19, %c0_20] : memref<1x32xf32, #tpu.memory_space<vmem>>, vector<1x32xf32>
    %29 = vector.broadcast %28 : vector<1x32xf32> to vector<16x32xf32>
    %30 = arith.addf %27, %29 : vector<16x32xf32>
    %c0_21 = arith.constant 0 : index
    %c0_22 = arith.constant 0 : index
    %31 = vector.load %arg11[%c0_21, %c0_22] : memref<16x32xf32, #tpu.memory_space<vmem>>, vector<16x32xf32>
    tpu.vector_store %arg11[%c0_21, %c0_22], %30 {strides = array<i32>} : memref<16x32xf32, #tpu.memory_space<vmem>>, vector<16x32xf32>,
    %32 = arith.truncf %30 : vector<16x32xf32> to vector<16x32xbf16>
    %c0_23 = arith.constant 0 : index
    %c0_24 = arith.constant 0 : index
    %33 = vector.load %arg9[%c0_23, %c0_24] : memref<32x16xbf16, #tpu.memory_space<vmem>>, vector<32x16xbf16>
    %cst_25 = arith.constant dense<0.000000e+00> : vector<16x16xf32>
    %34 = tpu.matmul %32, %33, %cst_25 {dimension_numbers = #tpu.dot_dimension_numbers<[1], [0], [0], [1], [0, 0, 1, 1], [], []>} : vector<16x32xbf16>, vector<32x16xbf16>, vector<16x16xf32> -> vector<16x16xf32>
    %c0_26 = arith.constant 0 : index
    %c0_27 = arith.constant 0 : index
    %35 = vector.load %arg10[%c0_26, %c0_27] : memref<1x16xf32, #tpu.memory_space<vmem>>, vector<1x16xf32>
    %36 = vector.broadcast %35 : vector<1x16xf32> to vector<16x16xf32>
    %37 = arith.addf %34, %36 : vector<16x16xf32>
    %38 = arith.mulf %37, %37 : vector<16x16xf32>
    %cst_28 = arith.constant dense<0.000000e+00> : vector<16xf32>
    %39 = vector.multi_reduction <add>, %38, %cst_28 [1] : vector<16x16xf32> to vector<16xf32>
    %40 = vector.shape_cast %39 : vector<16xf32> to vector<16x1xf32>
    %cst_29 = arith.constant 9.99999993E-9 : f32
    %cst_30 = arith.constant 9.99999993E-9 : f32
    %41 = arith.mulf %cst_29, %cst_30 : f32
    %42 = vector.broadcast %41 : f32 to vector<16x1xf32>
    %43 = arith.maximumf %40, %42 : vector<16x1xf32>
    %44 = math.rsqrt %43 : vector<16x1xf32>
    %45 = vector.broadcast %44 : vector<16x1xf32> to vector<16x16xf32>
    %46 = arith.mulf %37, %45 : vector<16x16xf32>
    %cst_31 = arith.constant dense<0.000000e+00> : vector<16x16xf32>
    %47 = tpu.matmul %46, %46, %cst_31 {dimension_numbers = #tpu.dot_dimension_numbers<[1], [1], [0], [0], [0, 0, 1, 0], [], []>} : vector<16x16xf32>, vector<16x16xf32>, vector<16x16xf32> -> vector<16x16xf32>
    %c0_32 = arith.constant 0 : index
    %c0_33 = arith.constant 0 : index
    %48 = vector.load %arg12[%c0_32, %c0_33] : memref<16x16xf32, #tpu.memory_space<vmem>>, vector<16x16xf32>
    tpu.vector_store %arg12[%c0_32, %c0_33], %47 {strides = array<i32>} : memref<16x16xf32, #tpu.memory_space<vmem>>, vector<16x16xf32>,
    return
  }
}

</mosaic_0001>

<bundles_post_ra>
// kernel: tpu_custom_call.1
= control target key start
LH: loop header
LB: loop body
LE: loop exit
PB: predicated region body
PF: predicated region fallthrough
CT: control target
= control target key end

     0   :  { %18 = vsyncpa [#allocation3], 0  ;;  %v624_v3 = vmov 0.0   ;;  %vm625_vm0 = vmmov 0   ;;  %v626_v7 = vmov 0   ;;  %s795_s0 = inlined_call_operand.vmem [shape: bf16[16,16], index: 0, kind: input, shape index: {}]   ;;  %s796_s1 = inlined_call_operand.vmem [shape: f32[16,8], index: 1, kind: input, shape index: {}]   ;;  %s797_s2 = inlined_call_operand.vmem [shape: f32[16,1], index: 2, kind: input, shape index: {}]   ;;  %s798_s3 = inlined_call_operand.vmem [shape: f32[16,8], index: 3, kind: input, shape index: {}]   ;;  %s799_s4 = inlined_call_operand.vmem [shape: f32[16,16], index: 4, kind: input, shape index: {}]   ;;  %s800_s5 = inlined_call_operand.vmem [shape: bf16[8,16], index: 5, kind: input, shape index: {}]   ;;  %s801_s6 = inlined_call_operand.vmem [shape: f32[1,16], index: 6, kind: input, shape index: {}]   ;;  %s802_s7 = inlined_call_operand.vmem [shape: bf16[16,32], index: 7, kind: input, shape index: {}]   ;;  %s803_s8 = inlined_call_operand.vmem [shape: f32[1,32], index: 8, kind: input, shape index: {}]   ;;  %s804_s9 = inlined_call_operand.vmem [shape: bf16[32,16], index: 9, kind: input, shape index: {}]   ;;  %s805_s10 = inlined_call_operand.vmem [shape: f32[1,16], index: 10, kind: input, shape index: {}]   ;;  %s806_s11 = inlined_call_operand.hbm [shape: f32[16,32], index: 11, kind: output, shape index: {0}]   ;;  %s807_s12 = inlined_call_operand.hbm [shape: f32[16,16], index: 12, kind: output, shape index: {1}]  }
   0x1   :  { %v47_v0 = vld [vmem:[%s796_s1] sm:$0xff]  ;;  %v48_v1 = vld [vmem:[%s796_s1 + $0x8] sm:$0xff]  ;;  %515 = vmatprep.subr.bf16.mxu0 %v624_v3  ;;  %517 = vmatprep.mubr.msk.bf16.mxu0 %vm625_vm0, %v624_v3 }
   0x2   :  { %v49_v2 = vld [vmem:[%s798_s3] sm:$0xff]  ;;  %v50_v4 = vld [vmem:[%s798_s3 + $0x8] sm:$0xff]  ;;  %567 = vset.pattern.permute.xlu0 %v626_v7  ;;  %521 = vmatprep.subr.bf16.mxu1 %v624_v3 }
   0x3   :  { %v51_v5 = vmul.f32 %v49_v2, %v47_v0  ;;  %v52_v6 = vmul.f32 %v50_v4, %v48_v1  ;;  %v45_v8 = vld [vmem:[%s797_s2] sm:$0xff]  ;;  %v46_v9 = vld [vmem:[%s797_s2 + $0x8] sm:$0xff]  ;;  %523 = vmatprep.mubr.msk.bf16.mxu1 %vm625_vm0, %v624_v3 }
   0x4   :  { %106 = vperm.xlu0 %567, %v45_v8   ;;  %v568_v11 = vld [vmem:[%s795_s0] sm:$0xff]  }
   0x5   :  { %v53_v10 = vpack.c.bf16 %v52_v6, %v51_v5 }
   0x6   :  { %19 = vsyncpa [#allocation5], 0  ;;  %vm59_vm1 = vcmask 130048   ;;  %v117_v12 = vld [vmem:[%s800_s5] sm:$0xf]  ;;  %vm129_vm2 = vcmask 1043456  }
   0x7   :  { %516 = vmatpush3.bf16.msra.mxu0 %v53_v10  ;;  %v131_v13 = vsel %vm129_vm2, %v117_v12, 0  ;;  %vm125_vm3 = vcmask 64512   ;;  %v486_v25 = vld [vmem:[%s801_s6] ss:$0 sm:$0xff]  ;;  %v177_v34 = vld [vmem:[%s799_s4 + $0x8] sm:$0xff]  ;;  %vm284_vm4 = vcmask 261120   ;;  %vm555_vm5 = vmpackc.low %vm59_vm1, %vm59_vm1 }
   0x8   :  { %111 = vperm.xlu0 %567, %v46_v9   ;;  %527 = vmatprep.subr.bf16.mxu0 %v624_v3  ;;  %v176_v33 = vld [vmem:[%s799_s4] sm:$0xff]  ;;  %v571_v50 = vld [vmem:[%s804_s9 + $0x8] sm:$0xff]  }
   0x9   :  { %522 = vmatpush3.bf16.msra.mxu1 %v131_v13  ;;  %v569_v39 = vld [vmem:[%s802_s7] sm:$0xff]  }
   0xa   :  { %518 = vmatmul.mubr.msk.bf16.vlgmr.msra.gmra.mrb[0].mxu0 %vm59_vm1, %v568_v11  ;;  %533 = vmatprep.subr.bf16.mxu1 %v624_v3  ;;  %v570_v49 = vld [vmem:[%s804_s9] sm:$0xff]  }
   0xb   :  { %529 = vmatprep.mubr.msk.bf16.mxu0 %vm625_vm0, %v624_v3  ;;  %v489_v51 = vld [vmem:[%s803_s8] ss:$0 sm:$0xff]  ;;  %s627_s8 = smov [#allocation2]  }
   0xc   :  { %v492_v59 = vld [vmem:[%s805_s10] ss:$0 sm:$0xff]  ;;  %s457_s9 = sshll.u32 %s627_s8, 4  ;;  %s458_s9 = int_to_ptr.vmem [resolvable:$true] %s457_s9 }
   0xd   :  { %s576_s10 = scalar_lea.vmem %s458_s9, 256  ;;  %p581_p1 = scmp.lt.s32.totalorder %s458_s9, %s458_s9 }
   0xe   :  { %p577_p0 = scmp.ne.s32.totalorder %s458_s9, %s576_s10  ;;  %p582_p2 = scmp.lt.s32.totalorder %s576_s10, %s576_s10 }
  0x10   :  { %p583_p3 = por %p582_p2, %p581_p1 }
  0x12   :  { %p584_p4 = pnand %p583_p3, %p577_p0 }
  0x83   :  { %v107_v14 = vpop.permute.xlu0 %106 }
  0x87   :  { %v112_v21 = vpop.permute.xlu0 %111 }
  0xdd   :  { %v97_v15 = vpop.f32.mrb[0].mxu0 }
  0xde   :  { %v98_v16 = vadd.f32 %v97_v15, %v51_v5  ;;  %v519_v17 = vpop.f32.mrb[1].mxu0 }
  0xdf   :  { %v100_v18 = vpop.f32.mrb[2].mxu0 }
  0xe0   :  { %v101_v19 = vadd.f32 %v100_v18, %v52_v6  ;;  %v520_v20 = vpop.f32.mrb[3].mxu0  ;;  %v114_v22 = vmul.f32 %v107_v14, %v98_v16 }
  0xe2   :  { %v115_v23 = vmul.f32 %v112_v21, %v101_v19 }
  0xe4   :  { %v116_v24 = vpack.c.bf16 %v115_v23, %v114_v22 }
  0xe6   :  { %524 = vmatmul.mubr.msk.bf16.vlgmr.msra.gmra.mrb[0].mxu1 %vm125_vm3, %v116_v24 }
  0xe7   :  { %535 = vmatprep.mubr.msk.bf16.mxu1 %vm625_vm0, %v624_v3  ;;  %534 = vmatpush3.bf16.msra.mxu1 %v569_v39 }
 0x1b9   :  { %v167_v26 = vpop.f32.mrb[0].mxu1 }
 0x1ba   :  { %v168_v27 = vadd.f32 %v486_v25, %v167_v26  ;;  %v525_v28 = vpop.f32.mrb[1].mxu1 }
 0x1bb   :  { %v170_v29 = vpop.f32.mrb[2].mxu1 }
 0x1bc   :  { %v174_v30 = vmax.f32 %v168_v27, 0.0  ;;  %v171_v31 = vadd.f32 %v486_v25, %v170_v29  ;;  %v526_v32 = vpop.f32.mrb[3].mxu1 }
 0x1be   :  { %v175_v35 = vmax.f32 %v171_v31, 0.0  ;;  %v178_v36 = vmul.f32 %v176_v33, %v174_v30 }
 0x1c0   :  { %v179_v37 = vmul.f32 %v177_v34, %v175_v35 }
 0x1c2   :  { %v180_v38 = vpack.c.bf16 %v179_v37, %v178_v36 }
 0x1c4   :  { %528 = vmatpush3.bf16.msra.mxu0 %v180_v38 }
 0x1c5   :  { %539 = vmatprep.subr.bf16.mxu0 %v624_v3 }
 0x1c7   :  { %530 = vmatmul.mubr.msk.bf16.vlgmr.msra.gmra.mrb[4].mxu0 %vm59_vm1, %v568_v11 }
 0x1c8   :  { %543 = vmatprep.mubr.msk.bf16.mxu0 %vm625_vm0, %v624_v3  ;;  %540 = vmatpush3.bf16.msra.mxu0 %v570_v49 }
 0x1c9   :  { %541 = vmatprep.subr.bf16.mxu0 %v624_v3 }
 0x1cc   :  { %542 = vmatpush3.bf16.msra.mxu0 %v571_v50 }
 0x29a   :  { %v215_v40 = vpop.f32.mrb[4].mxu0 }
 0x29b   :  { %v216_v41 = vadd.f32 %v215_v40, %v178_v36  ;;  %v531_v42 = vpop.f32.mrb[5].mxu0 }
 0x29c   :  { %v218_v43 = vpop.f32.mrb[6].mxu0 }
 0x29d   :  { %v219_v44 = vadd.f32 %v218_v43, %v179_v37  ;;  %v532_v45 = vpop.f32.mrb[7].mxu0  ;;  %v222_v46 = vmul.f32 %v216_v41, %v107_v14 }
 0x29f   :  { %v223_v47 = vmul.f32 %v219_v44, %v112_v21 }
 0x2a1   :  { %v224_v48 = vpack.c.bf16 %v223_v47, %v222_v46 }
 0x2a3   :  { %536 = vmatmul.mubr.msk.bf16.vlgmr.msra.gmra.mrb[4].mxu1 %vm59_vm1, %v224_v48 }
 0x376   :  { %v277_v52 = vpop.f32.mrb[4].mxu1 }
 0x377   :  { %v278_v53 = vadd.f32 %v489_v51, %v277_v52  ;;  %v537_v54 = vpop.f32.mrb[5].mxu1 }
 0x378   :  { %v280_v55 = vpop.f32.mrb[6].mxu1 }
 0x379   :  { %285 = vst.msk [vmem:[#allocation2] sm:$0xff] %vm284_vm4, %v278_v53  ;;  %v281_v56 = vadd.f32 %v489_v51, %v280_v55  ;;  %v538_v57 = vpop.f32.mrb[7].mxu1 }
 0x37b   :  { %286 = vst.msk [vmem:[#allocation2 + $0x8] sm:$0xff] %vm284_vm4, %v281_v56  ;;  %v287_v58 = vpack.c.bf16 %v281_v56, %v278_v53 }
 0x37d   :  { %544 = vmatmul.mubr.msk.bf16.vlgmr.msra.gmra.mrb[8].mxu0 %vm284_vm4, %v287_v58 }
 0x450   :  { %v348_v60 = vpop.f32.mrb[8].mxu0 }
 0x451   :  { %v349_v61 = vadd.f32 %v492_v59, %v348_v60  ;;  %v545_v62 = vpop.f32.mrb[9].mxu0 }
 0x452   :  { %v351_v63 = vpop.f32.mrb[10].mxu0 }
 0x453   :  { %v352_v0 = vadd.f32 %v492_v59, %v351_v63  ;;  %v546_v1 = vpop.f32.mrb[11].mxu0  ;;  %v355_v2 = vmul.f32 %v349_v61, %v349_v61 }
 0x455   :  { %v357_v3 = vsel %vm59_vm1, %v355_v2, 0.0  ;;  %v356_v4 = vmul.f32 %v352_v0, %v352_v0 }
 0x456   :  { %358 = vadd.xlane.f32.xlu1 %v357_v3 }
 0x457   :  { %v360_v5 = vsel %vm59_vm1, %v356_v4, 0.0 }
 0x45a   :  { %361 = vadd.xlane.f32.xlu1 %v360_v5 }
 0x4e3   :  { %v359_v6 = vpop.xlane.xlu1 %358 }
 0x4e4   :  { %v363_v7 = vmax.f32 %v359_v6, 1e-16 }
 0x4e6   :  { %572 = vrsqrt.f32 %v363_v7 }
 0x4e7   :  { %v362_v8 = vpop.xlane.xlu1 %361 }
 0x4e8   :  { %v364_v9 = vmax.f32 %v362_v8, 1e-16 }
 0x4ea   :  { %574 = vrsqrt.f32 %v364_v9 }
 0x4f0   :  { %v573_v10 = vpop.eup %572 }
 0x4f1   :  { %v367_v11 = vmul.f32 %v573_v10, %v349_v61 }
 0x4f3   :  { %551 = vmatprep.mubr.msk.f32.mxu1 %vm59_vm1, %v367_v11 }
 0x4f4   :  { %v575_v12 = vpop.eup %574 }
 0x4f5   :  { %v368_v13 = vmul.f32 %v575_v12, %v352_v0 }
 0x4f7   :  { %v554_v14 = vpack.c.bf16 %v368_v13, %v367_v11 }
 0x4f9   :  { %556 = vmatprep.subr.msk.bf16.mxu1 %vm555_vm5, %v554_v14 }
 0x4fa   :  { %559 = vmatpush3.bf16.xpose.msk.msra.mxu1 %vm555_vm5, %v554_v14 }
 0x501   :  { %552 = vmatmul.mubr.msk.f32.vlgmr.msra.gmra.mrb[8].mxu1 %vm59_vm1, %v368_v13 }
 0x502   :  { %587 = shalt.err (!%p584_p4)
}
 0x503   :  { %s588_s1 = scalar_lea.hbm %s806_s11, 256 }
 0x504   :  { %p589_p5 = scmp.ne.s32.totalorder %s806_s11, %s588_s1  ;;  %p592_p6 = scmp.lt.u32.totalorder %s588_s1, %s806_s11 }
 0x506   :  { %p594_p7 = pnand %p592_p6, %p589_p5 }
 0x508   :  { %597 = shalt.err (!%p594_p7)
}
 0x509   :  { %s628_s14 = smov 128   ;;  %s629_s2 = smov 8  }
 0x50a   :  { %463 = dma.vmem_to_hbm [thread:$0]  %s458_s9, 256, %s806_s11, [#allocation3], %s628_s14, %s628_s14, %s629_s2  }
 0x50b   :  { %s630_s5 = smov [#allocation4]  }
 0x50c   :  { %s469_s16 = sshll.u32 %s630_s5, 4  ;;  %s470_s16 = int_to_ptr.vmem [resolvable:$true] %s469_s16 }
 0x50d   :  { %s598_s17 = scalar_lea.vmem %s470_s16, 256  ;;  %p603_p9 = scmp.lt.s32.totalorder %s470_s16, %s470_s16 }
 0x50e   :  { %p599_p8 = scmp.ne.s32.totalorder %s470_s16, %s598_s17  ;;  %p604_p10 = scmp.lt.s32.totalorder %s598_s17, %s598_s17 }
 0x510   :  { %p605_p11 = por %p604_p10, %p603_p9 }
 0x512   :  { %p606_p12 = pnand %p605_p11, %p599_p8 }
 0x5d4   :  { %v553_v15 = vpop.f32.mrb[8].mxu1 }
 0x5d5   :  { %451 = vst.msk [vmem:[#allocation4 + $0x8] sm:$0xff] %vm59_vm1, %v553_v15  ;;  %v441_v16 = vpop.f32.mrb[9].mxu1 }
 0x5d6   :  { %450 = vst.msk [vmem:[#allocation4] sm:$0xff] %vm59_vm1, %v441_v16 }
 0x5d7   :  { %609 = shalt.err (!%p606_p12)
}
 0x5d8   :  { %s610_s11 = scalar_lea.hbm %s807_s12, 256 }
 0x5d9   :  { %p611_p13 = scmp.ne.s32.totalorder %s807_s12, %s610_s11  ;;  %p614_p0 = scmp.lt.u32.totalorder %s610_s11, %s807_s12 }
 0x5db   :  { %p616_p1 = pnand %p614_p0, %p611_p13 }
 0x5dd   :  { %619 = shalt.err (!%p616_p1)
}
 0x5de   :  { %475 = dma.vmem_to_hbm [thread:$0]  %s470_s16, 256, %s807_s12, [#allocation5], %s628_s14, %s628_s14, %s629_s2  }
 0x5df   :  { %620 = dma.done.wait [#allocation3], 256  }
 0x5e0   :  { %621 = vsyncadd [#allocation3], 4294967040 }
 0x5e1   :  { %622 = dma.done.wait [#allocation5], 256  }
 0x5e2   :  { %623 = vsyncadd [#allocation5], 4294967040 }
 0x5e3   :  { %482 = vsyncpa [#allocation3], 1 }
 0x5e4   :  { %483 = vsyncpa [#allocation5], 1 }

</bundles_post_ra>
